<compile_context>
chip_gen: v5e
topology: v5e:2x2
jax: 0.10.0
libtpu: 0.0.40
codegen_flags: <defaults>
</compile_context>

<pallas_src>
import math
import jax
import jax.numpy as jnp
from jax.experimental import pallas as pl
from jax.experimental.pallas import tpu as pltpu


def _round_up(v, m):
    return (v + m - 1) // m * m


def _nn_classifier_kernel(x_ref, p_ref, invp_ref, o_ref):
    """One (TB, TC) tile of the cosine nearest-prototype logits.

    x_ref:    (TB, D_pad) f32   batch tile (feature axis zero-padded)
    p_ref:    (TC, D_pad) mm    class tile of the prototype matrix
    invp_ref: (1, TC)    f32    precomputed temp * 1/max(||p_c||, 1e-12)
    o_ref:    (TB, TC)   f32
    """
    x = x_ref[...]

    # Raw similarity on the MXU: contract both operands over their last (lane)
    # dim -- no materialized transpose.  Operands may be bf16; accumulate f32.
    s = jax.lax.dot_general(
        x.astype(p_ref.dtype), p_ref[...],
        (((1,), (1,)), ((), ())),
        preferred_element_type=jnp.float32)

    # Per-row inverse norms from the unrounded f32 activations (EUP rsqrt):
    #   1 / max(sqrt(ss), 1e-12) == rsqrt(max(ss, 1e-24))
    inv_x = jax.lax.rsqrt(
        jnp.maximum(jnp.sum(x * x, axis=-1, keepdims=True), jnp.float32(1e-24)))

    # All scaling happens on the small (TB, TC) tile; temp is already folded
    # into invp_ref by the wrapper.
    o_ref[...] = (s * inv_x * invp_ref[...]).astype(o_ref.dtype)


def nn_classifier_forward(x, proto, temp, *, block_b=256, block_c=256,
                          mm_dtype=jnp.bfloat16):
    """x: (B, in_dim) f32, proto: (n_classes, in_dim) f32, temp: scalar f32."""
    B, D = x.shape
    C, D2 = proto.shape
    assert D == D2

    x = x.astype(jnp.float32)
    proto = proto.astype(jnp.float32)

    # Tile sizes: batch tile a multiple of 8 sublanes, class tile a multiple
    # of 128 lanes (256 default matches the 256-wide v6e/v7x MXU).
    D_pad = _round_up(D, 128)
    TB = min(block_b, _round_up(B, 8))
    TC = min(block_c, _round_up(C, 128))
    C_pad = _round_up(C, TC)

    # Feature padding only when needed; batch is NOT padded (partial edge
    # block handled by Pallas, garbage rows sliced off below).
    if D_pad != D:
        x = jnp.pad(x, ((0, 0), (0, D_pad - D)))

    # Hoisted, lane-dense prototype scale: temp * 1/max(||p_c||, 1e-12).
    # Computed once from the unrounded f32 proto; padded classes get 0 so the
    # padded logit columns are exactly zero.
    temp = jnp.asarray(temp, jnp.float32)
    inv_p = temp * jax.lax.rsqrt(
        jnp.maximum(jnp.sum(proto * proto, axis=-1), jnp.float32(1e-24)))
    if C_pad != C:
        inv_p = jnp.pad(inv_p, (0, C_pad - C))
    inv_p = inv_p.reshape(1, C_pad)

    if C_pad != C or D_pad != D:
        proto_p = jnp.pad(proto, ((0, C_pad - C), (0, D_pad - D)))
    else:
        proto_p = proto
    proto_mm = proto_p.astype(mm_dtype)

    grid = (pl.cdiv(B, TB), C_pad // TC)

    # Explicit VMEM budget (double-buffered tiles + headroom), clamped to the
    # v7x physical ceiling; raises v5e's 16 MiB scoped default.
    p_bytes = jnp.dtype(mm_dtype).itemsize
    tile_bytes = (TB * D_pad * 4          # x tile (f32)
                  + TC * D_pad * p_bytes  # proto tile
                  + TB * TC * 4           # out tile (f32)
                  + 8 * TC * 4)           # inv_p tile (8-sublane padded)
    vmem_limit = int(min(max(2 * tile_bytes + (4 << 20), 32 << 20), 64 << 20))

    out = pl.pallas_call(
        _nn_classifier_kernel,
        out_shape=jax.ShapeDtypeStruct((B, C_pad), jnp.float32),
        grid_spec=pltpu.PrefetchScalarGridSpec(
            num_scalar_prefetch=0,
            grid=grid,
            in_specs=[
                # x tile: constant over the inner class axis -> no re-DMA.
                pl.BlockSpec((TB, D_pad), lambda i, j: (i, 0)),
                # proto class tile.
                pl.BlockSpec((TC, D_pad), lambda i, j: (j, 0)),
                # precomputed temp/||p|| row slice.
                pl.BlockSpec((1, TC), lambda i, j: (0, j)),
            ],
            out_specs=pl.BlockSpec((TB, TC), lambda i, j: (i, j)),
        ),
        compiler_params=pltpu.CompilerParams(
            dimension_semantics=("parallel", "parallel"),
            vmem_limit_bytes=vmem_limit),
    )(x, proto_mm, inv_p)

    return out[:, :C]


def reference_forward(x, proto, temp):
    eps = 1e-12
    x_n = x / jnp.maximum(jnp.linalg.norm(x, axis=-1, keepdims=True), eps)
    p_n = proto / jnp.maximum(jnp.linalg.norm(proto, axis=-1, keepdims=True), eps)
    return (x_n @ p_n.T) * temp


if __name__ == "__main__":
    # Small shapes consistent with the module: x of (B, in_dim),
    # prototypes (n_classes, in_dim).
    B, in_dim, n_classes = 8, 128, 16

    key = jax.random.PRNGKey(0)
    k_x, k_p = jax.random.split(key)

    x = jax.random.normal(k_x, (B, in_dim), dtype=jnp.float32)

    # nn.init.kaiming_uniform_(proto, a=sqrt(5)):
    #   gain = sqrt(2 / (1 + a^2)) = sqrt(1/3); bound = gain * sqrt(3/fan_in)
    #        = sqrt(1 / fan_in)
    bound = math.sqrt(1.0 / in_dim)
    proto = jax.random.uniform(k_p, (n_classes, in_dim), dtype=jnp.float32,
                               minval=-bound, maxval=bound)

    temp = jnp.float32(10.0)  # learnable temperature for metric='cos'

    ref = reference_forward(x, proto, temp)

    # f32 MXU path: tight tolerance vs. the reference.
    out_f32 = jax.block_until_ready(
        nn_classifier_forward(x, proto, temp, mm_dtype=jnp.float32))
    assert out_f32.shape == (B, n_classes)
    assert jnp.allclose(out_f32, ref, atol=1e-4, rtol=1e-4), "f32 mismatch"

    # bf16 MXU path (default perf path): only the dot operands are rounded;
    # norms, rsqrt and accumulation stay f32.
    out_bf16 = jax.block_until_ready(nn_classifier_forward(x, proto, temp))
    assert out_bf16.shape == (B, n_classes)
    assert jnp.allclose(out_bf16, ref, atol=5e-2, rtol=5e-2), "bf16 mismatch"

    print("KERNEL_OK")
</pallas_src>

<mosaic_0001>
module attributes {stable_mosaic.version = 11 : i64} {
  func.func @_nn_classifier_kernel(%arg0: i32, %arg1: i32, %arg2: memref<8x128xf32, #tpu.memory_space<vmem>>, %arg3: memref<128x128xf32, #tpu.memory_space<vmem>>, %arg4: memref<1x128xf32, #tpu.memory_space<vmem>>, %arg5: memref<8x128xf32, #tpu.memory_space<vmem>>) attributes {dimension_semantics = [#tpu.dimension_semantics<parallel>, #tpu.dimension_semantics<parallel>], iteration_bounds = array<i64: 1, 1>, scalar_prefetch = 0 : i64, scratch_operands = 0 : i64, tpu.core_type = #tpu.core_type<tc>, window_params = [{transform_indices = @transform_0, window_bounds = array<i64: 8, 128>}, {transform_indices = @transform_1, window_bounds = array<i64: 128, 128>}, {transform_indices = @transform_2, window_bounds = array<i64: 1, 128>}, {transform_indices = @transform_3, window_bounds = array<i64: 8, 128>}]} {
    %c0 = arith.constant 0 : index
    %c0_0 = arith.constant 0 : index
    %0 = vector.load %arg2[%c0, %c0_0] : memref<8x128xf32, #tpu.memory_space<vmem>>, vector<8x128xf32>
    %c0_1 = arith.constant 0 : index
    %c0_2 = arith.constant 0 : index
    %1 = vector.load %arg3[%c0_1, %c0_2] : memref<128x128xf32, #tpu.memory_space<vmem>>, vector<128x128xf32>
    %cst = arith.constant dense<0.000000e+00> : vector<8x128xf32>
    %2 = tpu.matmul %0, %1, %cst {dimension_numbers = #tpu.dot_dimension_numbers<[1], [1], [0], [0], [0, 0, 1, 0], [], []>} : vector<8x128xf32>, vector<128x128xf32>, vector<8x128xf32> -> vector<8x128xf32>
    %3 = arith.mulf %0, %0 : vector<8x128xf32>
    %cst_3 = arith.constant dense<0.000000e+00> : vector<8xf32>
    %4 = vector.multi_reduction <add>, %3, %cst_3 [1] : vector<8x128xf32> to vector<8xf32>
    %5 = vector.shape_cast %4 : vector<8xf32> to vector<8x1xf32>
    %cst_4 = arith.constant 1.000000e-24 : f32
    %6 = vector.broadcast %cst_4 : f32 to vector<8x1xf32>
    %7 = arith.maximumf %5, %6 : vector<8x1xf32>
    %8 = math.rsqrt %7 : vector<8x1xf32>
    %9 = vector.broadcast %8 : vector<8x1xf32> to vector<8x128xf32>
    %10 = arith.mulf %2, %9 : vector<8x128xf32>
    %c0_5 = arith.constant 0 : index
    %c0_6 = arith.constant 0 : index
    %11 = vector.load %arg4[%c0_5, %c0_6] : memref<1x128xf32, #tpu.memory_space<vmem>>, vector<1x128xf32>
    %12 = vector.broadcast %11 : vector<1x128xf32> to vector<8x128xf32>
    %13 = arith.mulf %10, %12 : vector<8x128xf32>
    %c0_7 = arith.constant 0 : index
    %c0_8 = arith.constant 0 : index
    %14 = vector.load %arg5[%c0_7, %c0_8] : memref<8x128xf32, #tpu.memory_space<vmem>>, vector<8x128xf32>
    tpu.vector_store %arg5[%c0_7, %c0_8], %13 {strides = array<i32>} : memref<8x128xf32, #tpu.memory_space<vmem>>, vector<8x128xf32>,
    return
  }
  func.func @transform_0(%arg0: i32, %arg1: i32) -> (i32, i32) {
    %c0_i32 = arith.constant 0 : i32
    %c0_i32_0 = arith.constant 0 : i32
    return %arg0, %c0_i32 : i32, i32
  }
  func.func @transform_1(%arg0: i32, %arg1: i32) -> (i32, i32) {
    %c0_i32 = arith.constant 0 : i32
    %c0_i32_0 = arith.constant 0 : i32
    return %arg1, %c0_i32 : i32, i32
  }
  func.func @transform_2(%arg0: i32, %arg1: i32) -> (i32, i32) {
    %c0_i32 = arith.constant 0 : i32
    %c0_i32_0 = arith.constant 0 : i32
    return %c0_i32, %arg1 : i32, i32
  }
  func.func @transform_3(%arg0: i32, %arg1: i32) -> (i32, i32) {
    %c0_i32 = arith.constant 0 : i32
    return %arg0, %arg1 : i32, i32
  }
}

</mosaic_0001>

<bundles_post_ra>
// kernel: tpu_custom_call.1
= control target key start
LH: loop header
LB: loop body
LE: loop exit
PB: predicated region body
PF: predicated region fallthrough
CT: control target
= control target key end

     0   :  { %8 = vsyncpa [#allocation3], 0  ;;  %s244_s0 = inlined_call_operand.hbm [shape: f32[8,128], index: 0, kind: input, shape index: {}]   ;;  %s245_s1 = inlined_call_operand.hbm [shape: f32[128,128], index: 1, kind: input, shape index: {}]   ;;  %s246_s2 = inlined_call_operand.vmem [shape: f32[1,128], index: 2, kind: input, shape index: {}]   ;;  %s247_s3 = inlined_call_operand.hbm [shape: f32[8,128], index: 3, kind: output, shape index: {}]  }
   0x1   :  { %9 = vsyncpa [#allocation6], 0 }
   0x2   :  { %10 = vsyncpa [#allocation4], 0  ;;  %s16_s14 = sshll.u32 %s244_s0, 4  ;;  %s207_s15 = smov [#allocation2]   ;;  %s17_s14 = int_to_ptr.hbm [resolvable:$true] %s16_s14 }
   0x3   :  { %s18_s16 = sshll.u32 %s207_s15, 4  ;;  %s26_s19 = sshll.u32 %s245_s1, 4  ;;  %s19_s16 = int_to_ptr.vmem [resolvable:$true] %s18_s16  ;;  %s27_s19 = int_to_ptr.hbm [resolvable:$true] %s26_s19 }
   0x4   :  { %21 = dma.hbm_to_vmem [thread:$0]  %s17_s14, 128, %s19_s16, [#allocation3]  }
   0x5   :  { %s208_s20 = smov [#allocation5]   ;;  %s209_s22 = smov 128  }
   0x6   :  { %s28_s21 = sshll.u32 %s208_s20, 4  ;;  %s210_s23 = smov 8   ;;  %s29_s21 = int_to_ptr.vmem [resolvable:$true] %s28_s21 }
   0x7   :  { %34 = dma.hbm_to_vmem [thread:$0]  %s27_s19, 2048, %s29_s21, [#allocation6], %s209_s22, %s209_s22, %s210_s23  }
   0x8   :  { %201 = dma.done.wait [#allocation3], 128  }
   0x9   :  { %202 = vsyncadd [#allocation3], 4294967168 }
   0xa   :  { %203 = dma.done.wait [#allocation6], 2048  }
   0xb   :  { %204 = vsyncadd [#allocation6], 4294965248  ;;  %v61_v0 = vld [vmem:[#allocation5 + $0x78] sm:$0xff]  ;;  %v60_v1 = vld [vmem:[#allocation5 + $0x70] sm:$0xff]  ;;  %s211_s24 = smov [#allocation7]   ;;  %s110_s28 = sshll.u32 %s247_s3, 4  ;;  %s111_s28 = int_to_ptr.hbm [resolvable:$true] %s110_s28 }
   0xc   :  { %62 = vmatpush.xpose.msra.mxu0 %v61_v0  ;;  %v45_v2 = vld [vmem:[#allocation2] sm:$0xff]  ;;  %v59_v4 = vld [vmem:[#allocation5 + $0x68] sm:$0xff]  ;;  %v58_v5 = vld [vmem:[#allocation5 + $0x60] sm:$0xff]  ;;  %s108_s25 = sshll.u32 %s211_s24, 4  ;;  %s109_s25 = int_to_ptr.vmem [resolvable:$true] %s108_s25 }
   0xd   :  { %v82_v3 = vmul.f32 %v45_v2, %v45_v2  ;;  %v57_v6 = vld [vmem:[#allocation5 + $0x58] sm:$0xff]  ;;  %v56_v7 = vld [vmem:[#allocation5 + $0x50] sm:$0xff]  ;;  %v55_v8 = vld [vmem:[#allocation5 + $0x48] sm:$0xff] }
   0xe   :  { %v54_v9 = vld [vmem:[#allocation5 + $0x40] sm:$0xff]  ;;  %v53_v10 = vld [vmem:[#allocation5 + $0x38] sm:$0xff]  ;;  %v52_v11 = vld [vmem:[#allocation5 + $0x30] sm:$0xff] }
   0xf   :  { %83 = vadd.xlane.f32.xlu0 %v82_v3  ;;  %v51_v12 = vld [vmem:[#allocation5 + $0x28] sm:$0xff]  ;;  %v50_v13 = vld [vmem:[#allocation5 + $0x20] sm:$0xff]  ;;  %v49_v14 = vld [vmem:[#allocation5 + $0x18] sm:$0xff] }
  0x10   :  { %63 = vmatpush.xpose.msra.mxu0 %v60_v1  ;;  %v48_v15 = vld [vmem:[#allocation5 + $0x10] sm:$0xff]  ;;  %v47_v16 = vld [vmem:[#allocation5 + $0x8] sm:$0xff]  ;;  %v46_v17 = vld [vmem:[#allocation5] sm:$0xff] }
  0x11   :  { %v126_v26 = vld [vmem:[%s246_s2] ss:$0 sm:$0xff] }
  0x14   :  { %64 = vmatpush.xpose.msra.mxu0 %v59_v4 }
  0x18   :  { %65 = vmatpush.xpose.msra.mxu0 %v58_v5 }
  0x1c   :  { %66 = vmatpush.xpose.msra.mxu0 %v57_v6 }
  0x20   :  { %67 = vmatpush.xpose.msra.mxu0 %v56_v7 }
  0x24   :  { %68 = vmatpush.xpose.msra.mxu0 %v55_v8 }
  0x28   :  { %69 = vmatpush.xpose.msra.mxu0 %v54_v9 }
  0x2c   :  { %70 = vmatpush.xpose.msra.mxu0 %v53_v10 }
  0x30   :  { %71 = vmatpush.xpose.msra.mxu0 %v52_v11 }
  0x34   :  { %72 = vmatpush.xpose.msra.mxu0 %v51_v12 }
  0x38   :  { %73 = vmatpush.xpose.msra.mxu0 %v50_v13 }
  0x3c   :  { %74 = vmatpush.xpose.msra.mxu0 %v49_v14 }
  0x40   :  { %75 = vmatpush.xpose.msra.mxu0 %v48_v15 }
  0x44   :  { %76 = vmatpush.xpose.msra.mxu0 %v47_v16 }
  0x48   :  { %77 = vmatpush.xpose.msra.mxu0 %v46_v17 }
  0x4b   :  { %78 = vmatmul.f32.vlgmr.msra.gmra.mxu0 %v45_v2 }
  0x82   :  { %v84_v18 = vpop.xlane.xlu0 %83 }
  0x83   :  { %v85_v19 = vmax.f32 %v84_v18, 1e-24 }
  0x85   :  { %127 = vrsqrt.f32 %v85_v19  ;;  %vm92_vm0 = vweird.f32 %v85_v19 }
  0x8b   :  { %v128_v20 = vpop.eup %127 }
  0x8c   :  { %v87_v21 = vmul.f32 %v128_v20, %v85_v19  ;;  %vm93_vm1 = vweird.f32 %v128_v20 }
  0x8d   :  { %vm94_vm2 = vmor %vm92_vm0, %vm93_vm1 }
  0x8e   :  { %v88_v22 = vmul.f32 %v128_v20, %v87_v21 }
  0x90   :  { %v89_v23 = vmul.f32 0.5, %v88_v22 }
  0x92   :  { %v90_v24 = vsub.f32 1.5, %v89_v23 }
  0x94   :  { %v91_v25 = vmul.f32 %v128_v20, %v90_v24 }
  0x96   :  { %v95_v28 = vsel %vm94_vm2, %v128_v20, %v91_v25 }
  0xc8   :  { %v79_v27 = vpop.f32.mrf.mxu0 }
  0xc9   :  { %v96_v29 = vmul.f32 %v95_v28, %v79_v27 }
  0xcb   :  { %v101_v30 = vmul.f32 %v126_v26, %v96_v29 }
  0xcd   :  { %102 = vst [vmem:[#allocation7] sm:$0xff] %v101_v30 }
  0xce   :  { %113 = dma.vmem_to_hbm [thread:$0]  %s109_s25, 128, %s111_s28, [#allocation4]  }
  0xcf   :  { %205 = dma.done.wait [#allocation4], 128  }
  0xd0   :  { %206 = vsyncadd [#allocation4], 4294967168 }
  0xd1   :  { %118 = vsyncpa [#allocation3], 1 }
  0xd2   :  { %119 = vsyncpa [#allocation6], 1 }
  0xd3   :  { %120 = vsyncpa [#allocation4], 1 }

</bundles_post_ra>
